<compile_context>
chip_gen: v7x
topology: tpu7x:2x2x1
jax: 0.10.0
libtpu: 0.0.40
codegen_flags: <defaults>
</compile_context>

<pallas_src>
import functools

import jax
import jax.numpy as jnp
from jax import lax
from jax.experimental import pallas as pl
from jax.experimental.pallas import tpu as pltpu


def _warp_kernel(grid_ref, src_ref, disp_ref, out_ref, *, C, H, W, interpolation):
    """One batch item: grid_sample(src, grid + disp), align_corners=False, zeros padding."""
    P = H * W
    loc = grid_ref[...] + disp_ref[0]                      # [2, P] pixel-space coords
    # fold 2*p/(S-1)-1 normalization with align_corners=False un-normalization
    sy = loc[0:1, :] * (H / (H - 1.0)) - 0.5               # [1, P]
    sx = loc[1:2, :] * (W / (W - 1.0)) - 0.5               # [1, P]

    ky = lax.broadcasted_iota(jnp.int32, (H, P), 0).astype(jnp.float32)   # [H, P]
    kx = lax.broadcasted_iota(jnp.int32, (W, P), 0).astype(jnp.float32)   # [W, P]
    if interpolation == "bilinear":
        wy = jnp.maximum(0.0, 1.0 - jnp.abs(sy - ky))      # [H, P]
        wx = jnp.maximum(0.0, 1.0 - jnp.abs(sx - kx))      # [W, P]
    elif interpolation == "nearest":
        # grid_sample 'nearest' rounds half-to-even, same as jnp.round.
        wy = (jnp.round(sy) == ky).astype(jnp.float32)
        wx = (jnp.round(sx) == kx).astype(jnp.float32)
    else:
        raise ValueError(f"unsupported interpolation: {interpolation}")

    # stage 1: contract over x on the MXU: [C*H, W] @ [W, P] -> [C*H, P]
    t = jnp.dot(src_ref[0], wx, preferred_element_type=jnp.float32)
    # stage 2: weighted reduce over y (VPU multiply + cross-sublane sum)
    out = jnp.sum(t.reshape(C, H, P) * wy[None, :, :], axis=1)            # [C, P]
    out_ref[0] = out.astype(out_ref.dtype)


def spatial_transformer(src, disp, interpolation="bilinear"):
    """SpatialTransformer((H, W)).forward(src, disp): src [B,C,H,W], disp [B,2,H,W]."""
    B, C, H, W = src.shape
    assert disp.shape == (B, 2, H, W)
    assert H > 1 and W > 1, "1-pixel spatial dims are degenerate in the reference too"
    P = H * W

    # base sampling grid (get_grid): channel 0 = row/y index, channel 1 = col/x index
    gy = jnp.broadcast_to(jnp.arange(H, dtype=jnp.float32)[:, None], (H, W))
    gx = jnp.broadcast_to(jnp.arange(W, dtype=jnp.float32)[None, :], (H, W))
    grid_yx = jnp.stack([gy, gx], 0).reshape(2, P)

    src_f = src.reshape(B, C * H, W).astype(jnp.float32)   # MXU-LHS layout (free reshape)
    disp_f = disp.reshape(B, 2, P).astype(jnp.float32)     # lane-dense

    kernel = functools.partial(_warp_kernel, C=C, H=H, W=W, interpolation=interpolation)
    out = pl.pallas_call(
        kernel,
        out_shape=jax.ShapeDtypeStruct((B, C, P), jnp.float32),
        grid=(B,),
        in_specs=[
            pl.BlockSpec((2, P), lambda b: (0, 0)),             # base grid (shared)
            pl.BlockSpec((1, C * H, W), lambda b: (b, 0, 0)),   # src
            pl.BlockSpec((1, 2, P), lambda b: (b, 0, 0)),       # disp
        ],
        out_specs=pl.BlockSpec((1, C, P), lambda b: (b, 0, 0)), # lane-dense output
        compiler_params=pltpu.CompilerParams(dimension_semantics=("parallel",)),
    )(grid_yx, src_f, disp_f)
    return out.reshape(B, C, H, W).astype(src.dtype)


# ---------------------------------------------------------------------------
# Pure-JAX reference (independent gather formulation) for a correctness check.
# ---------------------------------------------------------------------------
def _grid_sample_ref(src, disp):
    B, C, H, W = src.shape
    gy = jnp.arange(H, dtype=jnp.float32)[None, :, None]
    gx = jnp.arange(W, dtype=jnp.float32)[None, None, :]
    sy = (gy + disp[:, 0]) * (H / (H - 1.0)) - 0.5        # [B, H, W]
    sx = (gx + disp[:, 1]) * (W / (W - 1.0)) - 0.5
    y0 = jnp.floor(sy)
    x0 = jnp.floor(sx)
    fy = sy - y0
    fx = sx - x0
    b_idx = jnp.arange(B)[:, None, None, None]
    c_idx = jnp.arange(C)[None, :, None, None]
    out = jnp.zeros((B, C, H, W), jnp.float32)
    for dy, wy in ((0, 1.0 - fy), (1, fy)):
        for dx, wx in ((0, 1.0 - fx), (1, fx)):
            yi = y0 + dy
            xi = x0 + dx
            valid = (yi >= 0) & (yi < H) & (xi >= 0) & (xi < W)
            yc = jnp.clip(yi, 0, H - 1).astype(jnp.int32)
            xc = jnp.clip(xi, 0, W - 1).astype(jnp.int32)
            vals = src[b_idx, c_idx, yc[:, None], xc[:, None]]
            w = (wy * wx * valid.astype(jnp.float32))[:, None]
            out = out + vals * w
    return out


if __name__ == "__main__":
    key = jax.random.PRNGKey(0)
    k1, k2 = jax.random.split(key)
    B, C, H, W = 2, 4, 16, 16
    src = jax.random.normal(k1, (B, C, H, W), dtype=jnp.float32)
    disp = 3.0 * jax.random.normal(k2, (B, 2, H, W), dtype=jnp.float32)

    out = spatial_transformer(src, disp, interpolation="bilinear")
    jax.block_until_ready(out)

    assert out.shape == (B, C, H, W) and out.dtype == jnp.float32
    assert bool(jnp.all(jnp.isfinite(out)))

    ref = _grid_sample_ref(src, disp)
    max_err = float(jnp.max(jnp.abs(out - ref)))
    assert max_err < 5e-2, f"mismatch vs grid_sample reference: max_err={max_err}"

    print("KERNEL_OK")
</pallas_src>

<mosaic_0001>
module attributes {stable_mosaic.version = 11 : i64} {
  func.func @_warp_kernel(%arg0: i32, %arg1: memref<2x256xf32, #tpu.memory_space<vmem>>, %arg2: memref<1x64x16xf32, #tpu.memory_space<vmem>>, %arg3: memref<1x2x256xf32, #tpu.memory_space<vmem>>, %arg4: memref<1x4x256xf32, #tpu.memory_space<vmem>>) attributes {dimension_semantics = [#tpu.dimension_semantics<parallel>], iteration_bounds = array<i64: 2>, scalar_prefetch = 0 : i64, scratch_operands = 0 : i64, tpu.core_type = #tpu.core_type<tc>, window_params = [{pipeline_mode = #tpu.pipeline_mode<synchronous>, transform_indices = @transform_0, window_bounds = array<i64: 2, 256>}, {transform_indices = @transform_1, window_bounds = array<i64: 1, 64, 16>}, {transform_indices = @transform_2, window_bounds = array<i64: 1, 2, 256>}, {transform_indices = @transform_3, window_bounds = array<i64: 1, 4, 256>}]} {
    %c0 = arith.constant 0 : index
    %c0_0 = arith.constant 0 : index
    %0 = vector.load %arg1[%c0, %c0_0] : memref<2x256xf32, #tpu.memory_space<vmem>>, vector<2x256xf32>
    %c0_1 = arith.constant 0 : index
    %c0_2 = arith.constant 0 : index
    %c0_3 = arith.constant 0 : index
    %1 = vector.load %arg3[%c0_1, %c0_2, %c0_3] : memref<1x2x256xf32, #tpu.memory_space<vmem>>, vector<1x2x256xf32>
    %2 = vector.shape_cast %1 : vector<1x2x256xf32> to vector<2x256xf32>
    %3 = arith.addf %0, %2 : vector<2x256xf32>
    %4 = vector.extract_strided_slice %3 {offsets = [0, 0], sizes = [1, 256], strides = [1, 1]} : vector<2x256xf32> to vector<1x256xf32>
    %cst = arith.constant 1.06666672 : f32
    %5 = vector.broadcast %cst : f32 to vector<1x256xf32>
    %6 = arith.mulf %4, %5 : vector<1x256xf32>
    %cst_4 = arith.constant 5.000000e-01 : f32
    %7 = vector.broadcast %cst_4 : f32 to vector<1x256xf32>
    %8 = arith.subf %6, %7 : vector<1x256xf32>
    %9 = vector.extract_strided_slice %3 {offsets = [1, 0], sizes = [1, 256], strides = [1, 1]} : vector<2x256xf32> to vector<1x256xf32>
    %cst_5 = arith.constant 1.06666672 : f32
    %10 = vector.broadcast %cst_5 : f32 to vector<1x256xf32>
    %11 = arith.mulf %9, %10 : vector<1x256xf32>
    %cst_6 = arith.constant 5.000000e-01 : f32
    %12 = vector.broadcast %cst_6 : f32 to vector<1x256xf32>
    %13 = arith.subf %11, %12 : vector<1x256xf32>
    %14 = tpu.iota {dimensions = array<i32: 0>} : vector<16x256xi32>
    %15 = arith.sitofp %14 : vector<16x256xi32> to vector<16x256xf32>
    %16 = tpu.iota {dimensions = array<i32: 0>} : vector<16x256xi32>
    %17 = arith.sitofp %16 : vector<16x256xi32> to vector<16x256xf32>
    %18 = vector.broadcast %8 : vector<1x256xf32> to vector<16x256xf32>
    %19 = arith.subf %18, %15 : vector<16x256xf32>
    %20 = math.absf %19 : vector<16x256xf32>
    %cst_7 = arith.constant 1.000000e+00 : f32
    %21 = vector.broadcast %cst_7 : f32 to vector<16x256xf32>
    %22 = arith.subf %21, %20 : vector<16x256xf32>
    %cst_8 = arith.constant 0.000000e+00 : f32
    %23 = vector.broadcast %cst_8 : f32 to vector<16x256xf32>
    %24 = arith.maximumf %23, %22 : vector<16x256xf32>
    %25 = vector.broadcast %13 : vector<1x256xf32> to vector<16x256xf32>
    %26 = arith.subf %25, %17 : vector<16x256xf32>
    %27 = math.absf %26 : vector<16x256xf32>
    %cst_9 = arith.constant 1.000000e+00 : f32
    %28 = vector.broadcast %cst_9 : f32 to vector<16x256xf32>
    %29 = arith.subf %28, %27 : vector<16x256xf32>
    %cst_10 = arith.constant 0.000000e+00 : f32
    %30 = vector.broadcast %cst_10 : f32 to vector<16x256xf32>
    %31 = arith.maximumf %30, %29 : vector<16x256xf32>
    %c0_11 = arith.constant 0 : index
    %c0_12 = arith.constant 0 : index
    %c0_13 = arith.constant 0 : index
    %32 = vector.load %arg2[%c0_11, %c0_12, %c0_13] : memref<1x64x16xf32, #tpu.memory_space<vmem>>, vector<1x64x16xf32>
    %33 = vector.shape_cast %32 : vector<1x64x16xf32> to vector<64x16xf32>
    %cst_14 = arith.constant dense<0.000000e+00> : vector<64x256xf32>
    %34 = tpu.matmul %33, %31, %cst_14 {dimension_numbers = #tpu.dot_dimension_numbers<[1], [0], [0], [1], [0, 0, 1, 1], [], []>} : vector<64x16xf32>, vector<16x256xf32>, vector<64x256xf32> -> vector<64x256xf32>
    %35 = vector.shape_cast %34 : vector<64x256xf32> to vector<4x16x256xf32>
    %36 = vector.shape_cast %24 : vector<16x256xf32> to vector<1x16x256xf32>
    %37 = vector.broadcast %36 : vector<1x16x256xf32> to vector<4x16x256xf32>
    %38 = arith.mulf %35, %37 : vector<4x16x256xf32>
    %cst_15 = arith.constant dense<0.000000e+00> : vector<4x256xf32>
    %39 = vector.multi_reduction <add>, %38, %cst_15 [1] : vector<4x16x256xf32> to vector<4x256xf32>
    %c0_16 = arith.constant 0 : index
    %c0_17 = arith.constant 0 : index
    %c0_18 = arith.constant 0 : index
    %40 = vector.load %arg4[%c0_16, %c0_17, %c0_18] : memref<1x4x256xf32, #tpu.memory_space<vmem>>, vector<1x4x256xf32>
    %41 = vector.shape_cast %40 : vector<1x4x256xf32> to vector<4x256xf32>
    %42 = vector.shape_cast %39 : vector<4x256xf32> to vector<1x4x256xf32>
    tpu.vector_store %arg4[%c0_16, %c0_17, %c0_18], %42 {strides = array<i32>} : memref<1x4x256xf32, #tpu.memory_space<vmem>>, vector<1x4x256xf32>,
    return
  }
  func.func @transform_0(%arg0: i32) -> (i32, i32) {
    %c0_i32 = arith.constant 0 : i32
    %c0_i32_0 = arith.constant 0 : i32
    %c0_i32_1 = arith.constant 0 : i32
    return %c0_i32, %c0_i32_0 : i32, i32
  }
  func.func @transform_1(%arg0: i32) -> (i32, i32, i32) {
    %c0_i32 = arith.constant 0 : i32
    %c0_i32_0 = arith.constant 0 : i32
    %c0_i32_1 = arith.constant 0 : i32
    return %arg0, %c0_i32, %c0_i32_0 : i32, i32, i32
  }
  func.func @transform_2(%arg0: i32) -> (i32, i32, i32) {
    %c0_i32 = arith.constant 0 : i32
    %c0_i32_0 = arith.constant 0 : i32
    %c0_i32_1 = arith.constant 0 : i32
    return %arg0, %c0_i32, %c0_i32_0 : i32, i32, i32
  }
  func.func @transform_3(%arg0: i32) -> (i32, i32, i32) {
    %c0_i32 = arith.constant 0 : i32
    %c0_i32_0 = arith.constant 0 : i32
    %c0_i32_1 = arith.constant 0 : i32
    return %arg0, %c0_i32, %c0_i32_0 : i32, i32, i32
  }
}

</mosaic_0001>

<bundles_post_ra>
// kernel: tpu_custom_call.1
= control target key start
LH: loop header
LB: loop body
LE: loop exit
PB: predicated region body
PF: predicated region fallthrough
CT: control target
= control target key end

     0   :  { %8 = vsyncpa [#allocation3], 0  ;;  %s897_s0 = inlined_call_operand.vmem [shape: f32[2,256], index: 0, kind: input, shape index: {}]   ;;  %s898_s1 = inlined_call_operand.vmem [shape: f32[2,64,16], index: 1, kind: input, shape index: {}]   ;;  %s899_s2 = inlined_call_operand.vmem [shape: f32[2,2,256], index: 2, kind: input, shape index: {}]   ;;  %s900_s3 = inlined_call_operand.hbm [shape: f32[2,4,256], index: 3, kind: output, shape index: {}]  }
   0x1   :  { %10 = vsyncpa [#allocation3 + $0x1], 0  ;;  %s759_s12 = smov 0   ;;  %s761_s13 = smov 0  }
   0x2   :  { %s763_s14 = smov 0   ;;  %s765_s15 = smov 0  }
   0x3 LB: > { %s780_s16 = sadd.s32 4294967295, %s735_s15   ;;  %s601_s17 = sadd.s32 4294967294, %s735_s15   ;;  %s735_s15 = sphi %s765_s15, %s906_s15   ;;  %s731_s14 = sphi %s763_s14, %s905_s14   ;;  %s727_s13 = sphi %s761_s13, %s904_s13   ;;  %s723_s12 = sphi %s759_s12, %s903_s12  }
   0x4   : > { %s784_s18 = sadd.s32 1, %s735_s15   ;;  %s96_s19 = sadd.s32 1, %s731_s14 }
   0x5   : > { %s93_s20 = ssub.s32 %s735_s15, %s784_s18  ;;  %p106_p0 = scmp.ne.s32.totalorder %s731_s14, %s727_s13 }
   0x6   : > { %p94_p1 = scmp.eq.s32.totalorder %s93_s20, 0  ;;  %p107_p2 = scmp.eq.s32.totalorder %s780_s16, 1 }
   0x7   : > { %p112_p3 = scmp.ne.s32.totalorder %s727_s13, %s723_s12  ;;  %p113_p4 = scmp.eq.s32.totalorder %s601_s17, 1 }
   0x8   : > { %s795_s21 = scalar_select %p94_p1, %s731_s14, %s96_s19  }
   0x9   : > { %p797_p5 = por %p107_p2, %p106_p0  ;;  %p801_p6 = por %p113_p4, %p112_p3 }
   0xa   : > { %p604_p7 = scmp.ge.s32.totalorder %s735_s15, 1  ;;  %p150_p8 = scmp.lt.s32.totalorder %s735_s15, 3 }
   0xc   : > { %p151_p9 = pnand %p604_p7, %p150_p8 }
   0xd   : > { %p179_p10 = scmp.lt.s32.totalorder (!%p151_p9), %s780_s16, 1  ;;  %v194_v0 = vlaneseq (!%p151_p9)  ;;  %v737_v1 = vmov (!%p151_p9), 0.0   ;;  %v189_v2 = vld [vmem:[%s897_s0] sm:$0xf] (!%p151_p9)  ;;  %vm276_vm0 = vcmask (!%p151_p9), 130048   ;;  %s176_s8 = sand.u32 (!%p151_p9), 1, %s727_s13  }
   0xe   : > { %154 = sbr.rel (%p151_p9) target bundleno = 315 (0x13b), region = 32  ;;  %365 = vmatprep.mubr.f32.mxu0 (!%p151_p9), %v737_v1  ;;  %389 = vmatprep.mubr.f32.mxu1 (!%p151_p9), %v737_v1  ;;  %s605_s9 = sshll.u32 (!%p151_p9), %s176_s8, 3  ;;  %vm499_vm1 = vcmask (!%p151_p9), 1041409   ;;  %vm501_vm2 = vcmask (!%p151_p9), 1045509   ;;  %vm504_vm3 = vcmask (!%p151_p9), 1042434   ;;  %vm506_vm4 = vcmask (!%p151_p9), 1046534  }
   0xf   : > { %v818_v3 = vshrl.u32 (!%p151_p9), %v194_v0, 7  ;;  %vm509_vm5 = vcmask (!%p151_p9), 1043459   ;;  %s626_s10 = sshll.u32 (!%p151_p9), %s780_s16, 7  ;;  %s178_s11 = scalar_lea.vmem (!%p151_p9), [#allocation2], %s605_s9  ;;  %vm511_vm6 = vcmask (!%p151_p9), 1047559  }
  0x10   : > { %s530_s17 = sshll.u32 (!%p151_p9), %s178_s11, 4  ;;  %s738_s26 = smov (!%p151_p9), [#allocation2]   ;;  %s857_s17 = int_to_ptr.vmem [resolvable:$true] %s530_s17 }
  0x11   : > { %v196_v7 = vadd.s32 (!%p151_p9), 8, %v818_v3  ;;  %v236_v8 = vsub.s32 (!%p151_p9), 1, %v818_v3  ;;  %v240_v9 = vsub.s32 (!%p151_p9), 3, %v818_v3  ;;  %v824_v11 = vcvt.s32.f32 (!%p151_p9), %v818_v3  ;;  %s677_s27 = sshll.u32 (!%p151_p9), %s738_s26, 4  ;;  %s678_s27 = int_to_ptr.vmem [resolvable:$false] %s677_s27 }
  0x12   : > { %v202_v43 = vsub.s32 (!%p151_p9), 0, %v818_v3  ;;  %v206_v44 = vsub.s32 (!%p151_p9), 2, %v818_v3  ;;  %s679_s28 = scalar_lea.vmem (!%p151_p9), %s678_s27, 256  ;;  %p680_p0 = scmp.lt.s32.totalorder (!%p151_p9), %s857_s17, %s678_s27 }
  0x13   : > { %v826_v12 = vcvt.s32.f32 (!%p151_p9), %v196_v7 }
  0x15   : > { %s809_s24 = scalar_select %p179_p10, %s780_s16, 1 }
  0x16   : > { %s516_s16 = scalar_lea.sflag [#allocation3], %s176_s8 }
  0x17   : > { %s625_s25 = sshll.u32 %s809_s24, 2  ;;  %s624_s4 = sshll.u32 %s809_s24, 6 }
  0x18   : > { %s188_s30 = scalar_lea.vmem %s899_s2, %s625_s25  ;;  %s183_s7 = scalar_lea.vmem %s898_s1, %s624_s4 }
  0x19   : > { %v190_v4 = vld [vmem:[%s188_s30] sm:$0xf]  ;;  %v269_v37 = vld [vmem:[%s183_s7 + $0x8] sm:$0xff]  ;;  %v270_v39 = vld [vmem:[%s183_s7 + $0x10] sm:$0xff]  ;;  %s855_s24 = scalar_lea.hbm %s900_s3, %s626_s10  ;;  %s673_s25 = scalar_lea.vmem %s857_s17, 128 }
  0x1a   : > { %v191_v5 = vadd.f32 %v190_v4, %v189_v2  ;;  %v268_v35 = vld [vmem:[%s183_s7] sm:$0xff]  ;;  %v273_v38 = vld [vmem:[%s183_s7 + $0x28] sm:$0xff]  ;;  %v274_v40 = vld [vmem:[%s183_s7 + $0x30] sm:$0xff]  ;;  %p674_p11 = scmp.ne.s32.totalorder %s857_s17, %s673_s25  ;;  %p681_p1 = scmp.lt.s32.totalorder %s679_s28, %s673_s25 }
  0x1b   : > { %v272_v36 = vld [vmem:[%s183_s7 + $0x20] sm:$0xff]  ;;  %v271_v41 = vld [vmem:[%s183_s7 + $0x18] sm:$0xff] }
  0x1c   : > { %v192_v6 = vmul.f32 1.0666667, %v191_v5  ;;  %v275_v42 = vld [vmem:[%s183_s7 + $0x38] sm:$0xff]  ;;  %p675_p12 = pnand %p674_p11, %p797_p5  ;;  %p682_p2 = por %p681_p1, %p680_p0 }
  0x1e   : > { %v610_v10 = vadd.f32 -0.5, %v192_v6  ;;  %p676_p13 = pneg %p675_p12 }
  0x20   : > { %v241_v13 = vrot.slane %v610_v10, %v240_v9  ;;  %v237_v14 = vrot.slane %v610_v10, %v236_v8  ;;  %v203_v45 = vrot.slane %v610_v10, %v202_v43  ;;  %v207_v46 = vrot.slane %v610_v10, %v206_v44  ;;  %p683_p3 = pnand %p682_p2, %p676_p13 }
  0x22   : > { %v251_v15 = vrot.slane %v241_v13, %v236_v8  ;;  %v247_v16 = vrot.slane %v237_v14, %v236_v8  ;;  %v213_v47 = vrot.slane %v203_v45, %v202_v43  ;;  %v217_v48 = vrot.slane %v207_v46, %v202_v43 }
  0x24   : > { %v253_v17 = vsub.f32 %v251_v15, %v824_v11  ;;  %v255_v18 = vsub.f32 %v251_v15, %v826_v12  ;;  %v252_v19 = vsub.f32 %v247_v16, %v824_v11  ;;  %v254_v20 = vsub.f32 %v247_v16, %v826_v12 }
  0x25   : > { %v218_v49 = vsub.f32 %v213_v47, %v824_v11  ;;  %v220_v50 = vsub.f32 %v213_v47, %v826_v12  ;;  %v219_v51 = vsub.f32 %v217_v48, %v824_v11  ;;  %v221_v52 = vsub.f32 %v217_v48, %v826_v12 }
  0x26   : > { %v257_v21 = vand.u32 2147483647, %v253_v17  ;;  %v259_v22 = vand.u32 2147483647, %v255_v18  ;;  %v256_v23 = vand.u32 2147483647, %v252_v19 }
  0x27   : > { %v258_v24 = vand.u32 2147483647, %v254_v20  ;;  %v222_v53 = vand.u32 2147483647, %v218_v49  ;;  %v224_v54 = vand.u32 2147483647, %v220_v50 }
  0x28   : > { %v261_v25 = vsub.f32 1.0, %v257_v21  ;;  %v263_v26 = vsub.f32 1.0, %v259_v22  ;;  %v260_v27 = vsub.f32 1.0, %v256_v23  ;;  %v223_v55 = vand.u32 2147483647, %v219_v51 }
  0x29   : > { %v262_v28 = vsub.f32 1.0, %v258_v24  ;;  %v225_v56 = vand.u32 2147483647, %v221_v52  ;;  %v226_v57 = vsub.f32 1.0, %v222_v53  ;;  %v228_v58 = vsub.f32 1.0, %v224_v54 }
  0x2a   : > { %v265_v29 = vmax.f32 %v261_v25, 0.0  ;;  %v267_v30 = vmax.f32 %v263_v26, 0.0  ;;  %v264_v31 = vmax.f32 %v260_v27, 0.0  ;;  %v227_v59 = vsub.f32 1.0, %v223_v55 }
  0x2b   : > { %v266_v32 = vmax.f32 %v262_v28, 0.0  ;;  %v229_v60 = vsub.f32 1.0, %v225_v56  ;;  %v230_v63 = vmax.f32 %v226_v57, 0.0  ;;  %v232_v2 = vmax.f32 %v228_v58, 0.0 }
  0x2c   : > { %v627_v33 = vpack.c.bf16 %v267_v30, %v265_v29  ;;  %v231_v3 = vmax.f32 %v227_v59, 0.0 }
  0x2d   : > { %v629_v34 = vpack.c.bf16 %v266_v32, %v264_v31  ;;  %v233_v4 = vmax.f32 %v229_v60, 0.0 }
  0x2e   : > { %628 = vmatprep.subr.bf16.mxu0 %v627_v33  ;;  %631 = vmatprep.subr.bf16.mxu1 %v627_v33 }
  0x2f   : > { %630 = vmatpush1.bf16.msra.mxu0 %v629_v34  ;;  %632 = vmatpush1.bf16.msra.mxu1 %v629_v34 }
  0x32   : > { %611 = vmatmul.mubr.msk.f32.vlgmr.msra.gmra.mrb[0].mxu0 %vm276_vm0, %v268_v35  ;;  %615 = vmatmul.mubr.msk.f32.vlgmr.msra.gmra.mrb[0].mxu1 %vm276_vm0, %v272_v36 }
  0x33   : > { %371 = vmatprep.mubr.f32.mxu0 %v737_v1  ;;  %395 = vmatprep.mubr.f32.mxu1 %v737_v1 }
  0x36   : > { %612 = vmatmul.mubr.msk.f32.gmra.mrb[2].mxu0 %vm276_vm0, %v269_v37  ;;  %616 = vmatmul.mubr.msk.f32.gmra.mrb[2].mxu1 %vm276_vm0, %v273_v38 }
  0x37   : > { %377 = vmatprep.mubr.f32.mxu0 %v737_v1  ;;  %401 = vmatprep.mubr.f32.mxu1 %v737_v1 }
  0x3a   : > { %613 = vmatmul.mubr.msk.f32.gmra.mrb[4].mxu0 %vm276_vm0, %v270_v39  ;;  %617 = vmatmul.mubr.msk.f32.gmra.mrb[4].mxu1 %vm276_vm0, %v274_v40 }
  0x3b   : > { %383 = vmatprep.mubr.f32.mxu0 %v737_v1  ;;  %407 = vmatprep.mubr.f32.mxu1 %v737_v1 }
  0x3e   : > { %614 = vmatmul.mubr.msk.f32.gmra.mrb[6].mxu0 %vm276_vm0, %v271_v41  ;;  %618 = vmatmul.mubr.msk.f32.gmra.mrb[6].mxu1 %vm276_vm0, %v275_v42 }
 0x105   : > { %v367_v61 = vpop.f32.mrb[0].mxu0  ;;  %v391_v62 = vpop.f32.mrb[0].mxu1 }
 0x106   : > { %v369_v0 = vpop.f32.mrb[1].mxu0  ;;  %v393_v1 = vpop.f32.mrb[1].mxu1  ;;  %v422_v5 = vmul.f32 %v391_v62, %v230_v63  ;;  %v414_v9 = vmul.f32 %v367_v61, %v230_v63 }
 0x107   : > { %v423_v6 = vmul.f32 %v393_v1, %v231_v3  ;;  %v415_v14 = vmul.f32 %v369_v0, %v231_v3 }
 0x109   : > { %v373_v7 = vpop.f32.mrb[2].mxu0  ;;  %v397_v8 = vpop.f32.mrb[2].mxu1 }
 0x10a   : > { %v416_v10 = vmul.f32 %v373_v7, %v232_v2  ;;  %v424_v11 = vmul.f32 %v397_v8, %v232_v2  ;;  %v375_v12 = vpop.f32.mrb[3].mxu0  ;;  %v399_v13 = vpop.f32.mrb[3].mxu1 }
 0x10b   : > { %v417_v15 = vmul.f32 %v375_v12, %v233_v4  ;;  %v425_v16 = vmul.f32 %v399_v13, %v233_v4 }
 0x10c   : > { %v430_v17 = vadd.f32 %v416_v10, %v414_v9  ;;  %v458_v18 = vadd.f32 %v424_v11, %v422_v5 }
 0x10d   : > { %v437_v19 = vadd.f32 %v417_v15, %v415_v14  ;;  %v465_v20 = vadd.f32 %v425_v16, %v423_v6  ;;  %v379_v21 = vpop.f32.mrb[4].mxu0  ;;  %v403_v22 = vpop.f32.mrb[4].mxu1 }
 0x10e   : > { %v431_v23 = vrot.slane %v430_v17, 4  ;;  %v459_v24 = vrot.slane %v458_v18, 4  ;;  %v381_v25 = vpop.f32.mrb[5].mxu0  ;;  %v405_v26 = vpop.f32.mrb[5].mxu1  ;;  %v418_v31 = vmul.f32 %v379_v21, %v230_v63  ;;  %v426_v32 = vmul.f32 %v403_v22, %v230_v63 }
 0x10f   : > { %v438_v27 = vrot.slane %v437_v19, 4  ;;  %v466_v28 = vrot.slane %v465_v20, 4  ;;  %v419_v35 = vmul.f32 %v381_v25, %v231_v3  ;;  %v427_v36 = vmul.f32 %v405_v26, %v231_v3 }
 0x110   : > { %v432_v29 = vadd.f32 %v431_v23, %v430_v17  ;;  %v460_v30 = vadd.f32 %v459_v24, %v458_v18 }
 0x111   : > { %v439_v33 = vadd.f32 %v438_v27, %v437_v19  ;;  %v467_v34 = vadd.f32 %v466_v28, %v465_v20  ;;  %v385_v37 = vpop.f32.mrb[6].mxu0  ;;  %v409_v38 = vpop.f32.mrb[6].mxu1 }
 0x112   : > { %v433_v39 = vrot.slane %v432_v29, 2  ;;  %v461_v40 = vrot.slane %v460_v30, 2  ;;  %v420_v41 = vmul.f32 %v385_v37, %v232_v2  ;;  %v428_v42 = vmul.f32 %v409_v38, %v232_v2  ;;  %v387_v43 = vpop.f32.mrb[7].mxu0  ;;  %v411_v44 = vpop.f32.mrb[7].mxu1 }
 0x113   : > { %v440_v45 = vrot.slane %v439_v33, 2  ;;  %v468_v46 = vrot.slane %v467_v34, 2  ;;  %v421_v47 = vmul.f32 %v387_v43, %v233_v4  ;;  %v429_v48 = vmul.f32 %v411_v44, %v233_v4 }
 0x114   : > { %v434_v49 = vadd.f32 %v433_v39, %v432_v29  ;;  %v462_v50 = vadd.f32 %v461_v40, %v460_v30  ;;  %v444_v51 = vadd.f32 %v420_v41, %v418_v31  ;;  %v472_v52 = vadd.f32 %v428_v42, %v426_v32 }
 0x115   : > { %v441_v53 = vadd.f32 %v440_v45, %v439_v33  ;;  %v469_v54 = vadd.f32 %v468_v46, %v467_v34  ;;  %v451_v55 = vadd.f32 %v421_v47, %v419_v35  ;;  %v479_v56 = vadd.f32 %v429_v48, %v427_v36 }
 0x116   : > { %v435_v57 = vrot.slane %v434_v49, 1  ;;  %v463_v58 = vrot.slane %v462_v50, 1  ;;  %v445_v59 = vrot.slane %v444_v51, 4  ;;  %v473_v60 = vrot.slane %v472_v52, 4 }
 0x117   : > { %v442_v61 = vrot.slane %v441_v53, 1  ;;  %v470_v62 = vrot.slane %v469_v54, 1  ;;  %v452_v63 = vrot.slane %v451_v55, 4  ;;  %v480_v0 = vrot.slane %v479_v56, 4 }
 0x118   : > { %v436_v1 = vadd.f32 %v435_v57, %v434_v49  ;;  %v464_v2 = vadd.f32 %v463_v58, %v462_v50  ;;  %v446_v3 = vadd.f32 %v445_v59, %v444_v51  ;;  %v474_v4 = vadd.f32 %v473_v60, %v472_v52 }
 0x119   : > { %v443_v5 = vadd.f32 %v442_v61, %v441_v53  ;;  %v471_v6 = vadd.f32 %v470_v62, %v469_v54  ;;  %v453_v7 = vadd.f32 %v452_v63, %v451_v55  ;;  %v481_v8 = vadd.f32 %v480_v0, %v479_v56 }
 0x11a   : > { %v447_v9 = vrot.slane %v446_v3, 2  ;;  %v475_v10 = vrot.slane %v474_v4, 2 }
 0x11b   : > { %v494_v11 = vcombine.low %v436_v1, %v443_v5  ;;  %v496_v12 = vcombine.low %v464_v2, %v471_v6  ;;  %v454_v13 = vrot.slane %v453_v7, 2  ;;  %v482_v14 = vrot.slane %v481_v8, 2 }
 0x11c   : > { %v448_v15 = vadd.f32 %v447_v9, %v446_v3  ;;  %v476_v16 = vadd.f32 %v475_v10, %v474_v4 }
 0x11d   : > { %v455_v17 = vadd.f32 %v454_v13, %v453_v7  ;;  %v483_v18 = vadd.f32 %v482_v14, %v481_v8  ;;  %v503_v30 = vrot.slane %v496_v12, 6 }
 0x11e   : > { %v449_v19 = vrot.slane %v448_v15, 1  ;;  %v477_v20 = vrot.slane %v476_v16, 1 }
 0x11f   : > { %v456_v21 = vrot.slane %v455_v17, 1  ;;  %v484_v22 = vrot.slane %v483_v18, 1 }
 0x120   : > { %v450_v23 = vadd.f32 %v449_v19, %v448_v15  ;;  %v478_v24 = vadd.f32 %v477_v20, %v476_v16 }
 0x121   : > { %v457_v25 = vadd.f32 %v456_v21, %v455_v17  ;;  %v485_v26 = vadd.f32 %v484_v22, %v483_v18 }
 0x123   : > { %v495_v27 = vcombine.low %v450_v23, %v457_v25  ;;  %v497_v28 = vcombine.low %v478_v24, %v485_v26 }
 0x125   : > { %v498_v29 = vrot.slane %v495_v27, 7  ;;  %v508_v34 = vrot.slane %v497_v28, 5 }
 0x127   : > { %v500_v31 = vsel %vm499_vm1, %v498_v29, %v494_v11 }
 0x128   : > { %v502_v32 = vsel %vm501_vm2, %v498_v29, %v500_v31 }
 0x129   : > { %v505_v33 = vsel %vm504_vm3, %v503_v30, %v502_v32 }
 0x12a   : > { %v507_v35 = vsel %vm506_vm4, %v503_v30, %v505_v33 }
 0x12b   : > { %v510_v36 = vsel %vm509_vm5, %v508_v34, %v507_v35 }
 0x12c   : > { %v512_v37 = vsel %vm511_vm6, %v508_v34, %v510_v36 }
 0x12d   : > { %514 = vst [vmem:[%s178_s11] sm:$0xff] %v512_v37 }
 0x12e   : > { %686 = shalt.err (!%p683_p3)
}
 0x12f   : > { %s687_s29 = scalar_lea.hbm %s855_s24, 128  ;;  %s691_s5 = scalar_lea.hbm %s900_s3, 256 }
 0x130   : > { %p688_p4 = scmp.ne.s32.totalorder %s855_s24, %s687_s29  ;;  %p692_p9 = scmp.lt.u32.totalorder %s855_s24, %s900_s3 }
 0x131   : > { %p693_p10 = scmp.lt.u32.totalorder %s691_s5, %s687_s29  ;;  %p695_p12 = scmp.lt.u32.totalorder %s687_s29, %s855_s24 }
 0x132   : > { %p689_p7 = pnand %p688_p4, %p797_p5 }
 0x133   : > { %p694_p11 = por %p693_p10, %p692_p9 }
 0x134   : > { %p690_p8 = pneg %p689_p7 }
 0x135   : > { %p696_p13 = por %p695_p12, %p694_p11 }
 0x137   : > { %p697_p0 = pnand %p696_p13, %p690_p8 }
 0x139   : > { %700 = shalt.err (!%p697_p0)
}
 0x13a   : > { %633 = dma.vmem_to_hbm [thread:$0]  (%p797_p5), %s857_s17, 128, %s855_s24, %s516_s16  }
 0x13b PF: > { %p639_p1 = scmp.ge.s32.totalorder %s735_s15, 2  ;;  %s542_s8 = sand.u32 1, %s723_s12  }
 0x13c   : > { %s543_s9 = scalar_lea.sflag [#allocation3], %s542_s8 }
 0x13d   : > { %p636_p2 = pnand %p639_p1, %p801_p6 }
 0x13f   : > { %718 = dma.done.wait (!%p636_p2), %s543_s9, 128  }
 0x140   : > { %720 = vsyncadd (!%p636_p2), %s543_s9, 4294967168  ;;  %p13_p3 = scmp.ge.s32.totalorder %s784_s18, 4   ;;  %s903_s12 = smov %s727_s13 }
 0x141   : > { %s904_s13 = smov %s731_s14  ;;  %s905_s14 = smov %s795_s21 }
 0x142   : > { %s906_s15 = smov %s784_s18  ;;  %15 = sbr.rel (!%p13_p3) target bundleno = 3 (0x3), region = 70 }
 0x149   :  { %548 = vsyncpa [#allocation3], 1 }
 0x14a   :  { %550 = vsyncpa [#allocation3 + $0x1], 1 }

</bundles_post_ra>
